<compile_context>
chip_gen: v5e
topology: v5e:2x2
jax: 0.10.0
libtpu: 0.0.40
codegen_flags: <defaults>
</compile_context>

<pallas_src>
import jax
import jax.numpy as jnp
from jax.experimental import pallas as pl
from jax.experimental.pallas import tpu as pltpu


def _bert_output_kernel(eps, inv_h, mxu_dtype, sub_rows, n_sub):
    def kernel(h_ref, w_ref, p_ref, res_ref, o_ref):
        w = w_ref[...]                                  # (I, H) bf16, resident
        b = p_ref[0:1, :]                               # (1, H) f32
        g = p_ref[1:2, :]                               # (1, H) f32
        be = p_ref[2:3, :]                              # (1, H) f32

        def body(s, carry):
            r0 = pl.multiple_of(s * sub_rows, sub_rows)
            rows = pl.ds(r0, sub_rows)
            # dense: (sub, I) @ (I, H), bf16 MXU feeds, f32 accumulation
            x = jnp.dot(h_ref[rows, :].astype(mxu_dtype), w,
                        preferred_element_type=jnp.float32)
            # bias + dropout(eval identity) + residual
            # TODO(synk): training-mode dropout (pltpu.prng_random_bits mask) not needed for inference parity
            x = x + b + res_ref[rows, :].astype(jnp.float32)
            # one-pass LayerNorm stats over the hidden axis (all f32)
            mean = jnp.sum(x, axis=-1, keepdims=True) * inv_h
            ex2 = jnp.sum(x * x, axis=-1, keepdims=True) * inv_h
            var = ex2 - mean * mean
            y = (x - mean) * jax.lax.rsqrt(var + eps)
            o_ref[rows, :] = (y * g + be).astype(o_ref.dtype)
            return carry

        jax.lax.fori_loop(0, n_sub, body, 0, unroll=True)

    return kernel


def bert_output(hidden_states, input_tensor, weight, bias, gamma, beta,
                *, eps=1e-12, tm=None, mxu_dtype=jnp.bfloat16):
    """hidden_states: (B, S, I); input_tensor (residual): (B, S, H).
    weight: (I, H) (== PyTorch Linear weight.T); bias/gamma/beta: (H,)."""
    B, S, I = hidden_states.shape
    H = input_tensor.shape[-1]
    T = B * S
    out_dtype = hidden_states.dtype

    # Per-TC VMEM capacity (v5e/v6e: 128 MiB, v7x: 64 MiB); conservative fallback.
    try:
        vmem_cap = int(pltpu.get_tpu_info().vmem_capacity_bytes)
    except Exception:
        vmem_cap = 64 * 1024 * 1024
    big_vmem = vmem_cap >= 96 * 1024 * 1024

    if tm is None:
        tm = 1024 if big_vmem else 512          # amortize per-step overhead on 128 MiB parts

    # Megacore load balance: guarantee >= 2 token blocks whenever T allows it.
    def _rup16(n):
        return ((n + 15) // 16) * 16
    tm = max(16, min(tm, _rup16(pl.cdiv(T, 2))))
    assert tm % 16 == 0, "token tile must be a multiple of 16 (bf16 sublane tile)"
    n_blocks = pl.cdiv(T, tm)                    # ragged final block handled by Pallas

    # Sub-chunking inside the block so the next matmul overlaps the LN epilogue.
    n_sub = 1
    for cand in (4, 2):
        if tm % (16 * cand) == 0:
            n_sub = cand
            break
    sub_rows = tm // n_sub

    # Layout / dtype plumbing (no HBM pad copies).
    h2d = hidden_states.reshape(T, I)
    if h2d.dtype != mxu_dtype:
        h2d = h2d.astype(mxu_dtype)              # halve dominant HBM stream; MXU feed is bf16 anyway
    r2d = input_tensor.reshape(T, H)
    w = weight.astype(mxu_dtype)                 # resident bf16 weight
    params = jnp.stack([bias.astype(jnp.float32),
                        gamma.astype(jnp.float32),
                        beta.astype(jnp.float32)], axis=0)   # (3, H) f32, resident

    def nbytes(a):
        return a.size * jnp.dtype(a.dtype).itemsize

    def itm(dt):
        return jnp.dtype(dt).itemsize

    # VMEM budget: double-buffered streaming tiles + single-buffered residents + margin.
    stream_bytes = 2 * tm * (I * itm(h2d.dtype) + H * itm(r2d.dtype) + H * itm(out_dtype))
    resident_bytes = nbytes(w) + nbytes(params)
    margin = 4 * 1024 * 1024
    cap = (100 << 20) if big_vmem else (52 << 20)
    vmem_limit = int(min(cap, max(16 << 20, stream_bytes + resident_bytes + margin)))

    out_bytes = T * H * itm(out_dtype)
    cost = pl.CostEstimate(
        flops=2 * T * I * H + 10 * T * H,
        transcendentals=T,                       # one rsqrt per row
        bytes_accessed=nbytes(h2d) + nbytes(w) + nbytes(r2d) + nbytes(params) + out_bytes,
    )

    out2d = pl.pallas_call(
        _bert_output_kernel(float(eps), float(1.0 / H), mxu_dtype, sub_rows, n_sub),
        out_shape=jax.ShapeDtypeStruct((T, H), out_dtype),
        grid_spec=pltpu.PrefetchScalarGridSpec(
            num_scalar_prefetch=0,
            grid=(n_blocks,),
            in_specs=[
                pl.BlockSpec((tm, I), lambda i: (i, 0)),            # activation tile (streamed)
                pl.BlockSpec((I, H), lambda i: (0, 0),
                             pipeline_mode=pl.Buffered(1)),          # weight (resident, 1 buffer)
                pl.BlockSpec((3, H), lambda i: (0, 0),
                             pipeline_mode=pl.Buffered(1)),          # bias/gamma/beta (resident)
                pl.BlockSpec((tm, H), lambda i: (i, 0)),             # residual tile (streamed)
            ],
            out_specs=pl.BlockSpec((tm, H), lambda i: (i, 0)),
        ),
        compiler_params=pltpu.CompilerParams(
            dimension_semantics=("parallel",),                       # shard token blocks across TCs
            vmem_limit_bytes=vmem_limit,
        ),
        cost_estimate=cost,
    )(h2d, w, params, r2d)

    return out2d.reshape(B, S, H)


if __name__ == "__main__":
    # Small BERT-like config (lane-dense H): intermediate_size=512, hidden_size=128.
    # S=24 with tm=32 exercises a multi-block grid with a ragged final block
    # and the in-block sub-chunk loop (sub_rows=16).
    B, S = 2, 24
    INTERMEDIATE, HIDDEN = 512, 128
    EPS = 1e-12

    key = jax.random.PRNGKey(0)
    k1, k2, k3, k4 = jax.random.split(key, 4)

    hidden_states = jax.random.normal(
        k1, (B, S, INTERMEDIATE), dtype=jnp.float32).astype(jnp.bfloat16)
    input_tensor = jax.random.normal(
        k2, (B, S, HIDDEN), dtype=jnp.float32).astype(jnp.bfloat16)
    weight = (jax.random.normal(k3, (INTERMEDIATE, HIDDEN), dtype=jnp.float32)
              * 0.02).astype(jnp.bfloat16)              # (I, H) == Linear weight.T
    bias = jax.random.normal(k4, (HIDDEN,), dtype=jnp.float32) * 0.02
    gamma = jnp.ones((HIDDEN,), dtype=jnp.float32)
    beta = jnp.zeros((HIDDEN,), dtype=jnp.float32)

    out = bert_output(hidden_states, input_tensor, weight, bias, gamma, beta,
                      eps=EPS, tm=32)
    out = jax.block_until_ready(out)
    assert out.shape == (B, S, HIDDEN) and out.dtype == jnp.bfloat16

    # Reference: f32 math on the bf16-rounded values (matches kernel's
    # bf16-operand / f32-accumulate matmul + f32 LayerNorm).
    h32 = hidden_states.astype(jnp.float32).reshape(-1, INTERMEDIATE)
    r32 = input_tensor.astype(jnp.float32).reshape(-1, HIDDEN)
    w32 = weight.astype(jnp.float32)
    x_ref = h32 @ w32 + bias
    x_ref = x_ref + r32
    mu = x_ref.mean(-1, keepdims=True)
    var = ((x_ref - mu) ** 2).mean(-1, keepdims=True)
    ref = ((x_ref - mu) / jnp.sqrt(var + EPS)) * gamma + beta
    ref = ref.reshape(B, S, HIDDEN)

    max_err = float(jnp.max(jnp.abs(out.astype(jnp.float32) - ref)))
    # Output is stored in bf16 -> allow bf16 rounding of O(1) LayerNorm values.
    assert max_err < 5e-2, f"mismatch vs reference, max abs err {max_err}"

    print("KERNEL_OK")
</pallas_src>

<mosaic_0001>
module attributes {stable_mosaic.version = 11 : i64} {
  func.func @kernel(%arg0: i32, %arg1: memref<32x512xbf16, #tpu.memory_space<vmem>>, %arg2: memref<512x128xbf16, #tpu.memory_space<vmem>>, %arg3: memref<3x128xf32, #tpu.memory_space<vmem>>, %arg4: memref<32x128xbf16, #tpu.memory_space<vmem>>, %arg5: memref<32x128xbf16, #tpu.memory_space<vmem>>) attributes {dimension_semantics = [#tpu.dimension_semantics<parallel>], iteration_bounds = array<i64: 2>, scalar_prefetch = 0 : i64, scratch_operands = 0 : i64, tpu.core_type = #tpu.core_type<tc>, window_params = [{transform_indices = @transform_0, window_bounds = array<i64: 32, 512>}, {pipeline_mode = #tpu.pipeline_mode<synchronous>, transform_indices = @transform_1, window_bounds = array<i64: 512, 128>}, {pipeline_mode = #tpu.pipeline_mode<synchronous>, transform_indices = @transform_2, window_bounds = array<i64: 3, 128>}, {transform_indices = @transform_3, window_bounds = array<i64: 32, 128>}, {transform_indices = @transform_4, window_bounds = array<i64: 32, 128>}]} {
    %c0 = arith.constant 0 : index
    %c0_0 = arith.constant 0 : index
    %0 = vector.load %arg2[%c0, %c0_0] : memref<512x128xbf16, #tpu.memory_space<vmem>>, vector<512x128xbf16>
    %c0_1 = arith.constant 0 : index
    %c0_2 = arith.constant 0 : index
    %1 = vector.load %arg3[%c0_1, %c0_2] : memref<3x128xf32, #tpu.memory_space<vmem>>, vector<1x128xf32>
    %c1 = arith.constant 1 : index
    %c0_3 = arith.constant 0 : index
    %2 = vector.load %arg3[%c1, %c0_3] : memref<3x128xf32, #tpu.memory_space<vmem>>, vector<1x128xf32>
    %c2 = arith.constant 2 : index
    %c0_4 = arith.constant 0 : index
    %3 = vector.load %arg3[%c2, %c0_4] : memref<3x128xf32, #tpu.memory_space<vmem>>, vector<1x128xf32>
    %c0_i32 = arith.constant 0 : i32
    %c16_i32 = arith.constant 16 : i32
    %4 = arith.muli %c0_i32, %c16_i32 : i32
    %5 = tpu.assume_multiple %4, 16 : i32
    %6 = arith.index_cast %5 : i32 to index
    %c0_5 = arith.constant 0 : index
    %7 = vector.load %arg1[%6, %c0_5] : memref<32x512xbf16, #tpu.memory_space<vmem>>, vector<16x512xbf16>
    %cst = arith.constant dense<0.000000e+00> : vector<16x128xf32>
    %8 = tpu.matmul %7, %0, %cst {dimension_numbers = #tpu.dot_dimension_numbers<[1], [0], [0], [1], [0, 0, 1, 1], [], []>} : vector<16x512xbf16>, vector<512x128xbf16>, vector<16x128xf32> -> vector<16x128xf32>
    %9 = vector.broadcast %1 : vector<1x128xf32> to vector<16x128xf32>
    %10 = arith.addf %8, %9 : vector<16x128xf32>
    %11 = arith.index_cast %5 : i32 to index
    %c0_6 = arith.constant 0 : index
    %12 = vector.load %arg4[%11, %c0_6] : memref<32x128xbf16, #tpu.memory_space<vmem>>, vector<16x128xbf16>
    %13 = arith.extf %12 : vector<16x128xbf16> to vector<16x128xf32>
    %14 = arith.addf %10, %13 : vector<16x128xf32>
    %cst_7 = arith.constant dense<0.000000e+00> : vector<16xf32>
    %15 = vector.multi_reduction <add>, %14, %cst_7 [1] : vector<16x128xf32> to vector<16xf32>
    %16 = vector.shape_cast %15 : vector<16xf32> to vector<16x1xf32>
    %cst_8 = arith.constant 7.812500e-03 : f32
    %17 = vector.broadcast %cst_8 : f32 to vector<16x1xf32>
    %18 = arith.mulf %16, %17 : vector<16x1xf32>
    %19 = arith.mulf %14, %14 : vector<16x128xf32>
    %cst_9 = arith.constant dense<0.000000e+00> : vector<16xf32>
    %20 = vector.multi_reduction <add>, %19, %cst_9 [1] : vector<16x128xf32> to vector<16xf32>
    %21 = vector.shape_cast %20 : vector<16xf32> to vector<16x1xf32>
    %cst_10 = arith.constant 7.812500e-03 : f32
    %22 = vector.broadcast %cst_10 : f32 to vector<16x1xf32>
    %23 = arith.mulf %21, %22 : vector<16x1xf32>
    %24 = arith.mulf %18, %18 : vector<16x1xf32>
    %25 = arith.subf %23, %24 : vector<16x1xf32>
    %26 = vector.broadcast %18 : vector<16x1xf32> to vector<16x128xf32>
    %27 = arith.subf %14, %26 : vector<16x128xf32>
    %cst_11 = arith.constant 9.99999996E-13 : f32
    %28 = vector.broadcast %cst_11 : f32 to vector<16x1xf32>
    %29 = arith.addf %25, %28 : vector<16x1xf32>
    %30 = math.rsqrt %29 : vector<16x1xf32>
    %31 = vector.broadcast %30 : vector<16x1xf32> to vector<16x128xf32>
    %32 = arith.mulf %27, %31 : vector<16x128xf32>
    %33 = vector.broadcast %2 : vector<1x128xf32> to vector<16x128xf32>
    %34 = arith.mulf %32, %33 : vector<16x128xf32>
    %35 = vector.broadcast %3 : vector<1x128xf32> to vector<16x128xf32>
    %36 = arith.addf %34, %35 : vector<16x128xf32>
    %37 = arith.truncf %36 : vector<16x128xf32> to vector<16x128xbf16>
    %38 = arith.index_cast %5 : i32 to index
    %c0_12 = arith.constant 0 : index
    %39 = vector.load %arg5[%38, %c0_12] : memref<32x128xbf16, #tpu.memory_space<vmem>>, vector<16x128xbf16>
    tpu.vector_store %arg5[%38, %c0_12], %37 {strides = array<i32>} : memref<32x128xbf16, #tpu.memory_space<vmem>>, vector<16x128xbf16>,
    %c1_i32 = arith.constant 1 : i32
    %c16_i32_13 = arith.constant 16 : i32
    %40 = arith.muli %c1_i32, %c16_i32_13 : i32
    %41 = tpu.assume_multiple %40, 16 : i32
    %42 = arith.index_cast %41 : i32 to index
    %c0_14 = arith.constant 0 : index
    %43 = vector.load %arg1[%42, %c0_14] : memref<32x512xbf16, #tpu.memory_space<vmem>>, vector<16x512xbf16>
    %cst_15 = arith.constant dense<0.000000e+00> : vector<16x128xf32>
    %44 = tpu.matmul %43, %0, %cst_15 {dimension_numbers = #tpu.dot_dimension_numbers<[1], [0], [0], [1], [0, 0, 1, 1], [], []>} : vector<16x512xbf16>, vector<512x128xbf16>, vector<16x128xf32> -> vector<16x128xf32>
    %45 = vector.broadcast %1 : vector<1x128xf32> to vector<16x128xf32>
    %46 = arith.addf %44, %45 : vector<16x128xf32>
    %47 = arith.index_cast %41 : i32 to index
    %c0_16 = arith.constant 0 : index
    %48 = vector.load %arg4[%47, %c0_16] : memref<32x128xbf16, #tpu.memory_space<vmem>>, vector<16x128xbf16>
    %49 = arith.extf %48 : vector<16x128xbf16> to vector<16x128xf32>
    %50 = arith.addf %46, %49 : vector<16x128xf32>
    %cst_17 = arith.constant dense<0.000000e+00> : vector<16xf32>
    %51 = vector.multi_reduction <add>, %50, %cst_17 [1] : vector<16x128xf32> to vector<16xf32>
    %52 = vector.shape_cast %51 : vector<16xf32> to vector<16x1xf32>
    %cst_18 = arith.constant 7.812500e-03 : f32
    %53 = vector.broadcast %cst_18 : f32 to vector<16x1xf32>
    %54 = arith.mulf %52, %53 : vector<16x1xf32>
    %55 = arith.mulf %50, %50 : vector<16x128xf32>
    %cst_19 = arith.constant dense<0.000000e+00> : vector<16xf32>
    %56 = vector.multi_reduction <add>, %55, %cst_19 [1] : vector<16x128xf32> to vector<16xf32>
    %57 = vector.shape_cast %56 : vector<16xf32> to vector<16x1xf32>
    %cst_20 = arith.constant 7.812500e-03 : f32
    %58 = vector.broadcast %cst_20 : f32 to vector<16x1xf32>
    %59 = arith.mulf %57, %58 : vector<16x1xf32>
    %60 = arith.mulf %54, %54 : vector<16x1xf32>
    %61 = arith.subf %59, %60 : vector<16x1xf32>
    %62 = vector.broadcast %54 : vector<16x1xf32> to vector<16x128xf32>
    %63 = arith.subf %50, %62 : vector<16x128xf32>
    %cst_21 = arith.constant 9.99999996E-13 : f32
    %64 = vector.broadcast %cst_21 : f32 to vector<16x1xf32>
    %65 = arith.addf %61, %64 : vector<16x1xf32>
    %66 = math.rsqrt %65 : vector<16x1xf32>
    %67 = vector.broadcast %66 : vector<16x1xf32> to vector<16x128xf32>
    %68 = arith.mulf %63, %67 : vector<16x128xf32>
    %69 = vector.broadcast %2 : vector<1x128xf32> to vector<16x128xf32>
    %70 = arith.mulf %68, %69 : vector<16x128xf32>
    %71 = vector.broadcast %3 : vector<1x128xf32> to vector<16x128xf32>
    %72 = arith.addf %70, %71 : vector<16x128xf32>
    %73 = arith.truncf %72 : vector<16x128xf32> to vector<16x128xbf16>
    %74 = arith.index_cast %41 : i32 to index
    %c0_22 = arith.constant 0 : index
    %75 = vector.load %arg5[%74, %c0_22] : memref<32x128xbf16, #tpu.memory_space<vmem>>, vector<16x128xbf16>
    tpu.vector_store %arg5[%74, %c0_22], %73 {strides = array<i32>} : memref<32x128xbf16, #tpu.memory_space<vmem>>, vector<16x128xbf16>,
    %c2_i32 = arith.constant 2 : i32
    return
  }
  func.func @transform_0(%arg0: i32) -> (i32, i32) {
    %c0_i32 = arith.constant 0 : i32
    %c0_i32_0 = arith.constant 0 : i32
    return %arg0, %c0_i32 : i32, i32
  }
  func.func @transform_1(%arg0: i32) -> (i32, i32) {
    %c0_i32 = arith.constant 0 : i32
    %c0_i32_0 = arith.constant 0 : i32
    %c0_i32_1 = arith.constant 0 : i32
    return %c0_i32, %c0_i32_0 : i32, i32
  }
  func.func @transform_2(%arg0: i32) -> (i32, i32) {
    %c0_i32 = arith.constant 0 : i32
    %c0_i32_0 = arith.constant 0 : i32
    %c0_i32_1 = arith.constant 0 : i32
    return %c0_i32, %c0_i32_0 : i32, i32
  }
  func.func @transform_3(%arg0: i32) -> (i32, i32) {
    %c0_i32 = arith.constant 0 : i32
    %c0_i32_0 = arith.constant 0 : i32
    return %arg0, %c0_i32 : i32, i32
  }
  func.func @transform_4(%arg0: i32) -> (i32, i32) {
    %c0_i32 = arith.constant 0 : i32
    %c0_i32_0 = arith.constant 0 : i32
    return %arg0, %c0_i32 : i32, i32
  }
}

</mosaic_0001>

<bundles_post_ra>
// kernel: tpu_custom_call.1
= control target key start
LH: loop header
LB: loop body
LE: loop exit
PB: predicated region body
PF: predicated region fallthrough
CT: control target
= control target key end

     0   :  { %s2025_s0 = inlined_call_operand.hbm [shape: bf16[48,512], index: 0, kind: input, shape index: {}]   ;;  %s2026_s1 = inlined_call_operand.hbm [shape: bf16[512,128], index: 1, kind: input, shape index: {}]   ;;  %s2027_s2 = inlined_call_operand.hbm [shape: f32[3,128], index: 2, kind: input, shape index: {}]   ;;  %s2028_s3 = inlined_call_operand.hbm [shape: bf16[48,128], index: 3, kind: input, shape index: {}]   ;;  %s2029_s4 = inlined_call_operand.hbm [shape: bf16[48,128], index: 4, kind: output, shape index: {}]  }
   0x1   :  { %2033 = sst [smem:[#allocation15_spill]] %s2026_s1 }
   0x2   :  { %9 = vsyncpa [#allocation3], 0 }
   0x3   :  { %11 = vsyncpa [#allocation3 + $0x1], 0 }
   0x4   :  { %12 = vsyncpa [#allocation6], 0 }
   0x5   :  { %13 = vsyncpa [#allocation9], 0 }
   0x6   :  { %15 = vsyncpa [#allocation9 + $0x1], 0 }
   0x7   :  { %16 = vsyncpa [#allocation4], 0 }
   0x8   :  { %18 = vsyncpa [#allocation4 + $0x1], 0  ;;  %s1620_s15 = smov 0   ;;  %s1622_s16 = smov 0  }
   0x9   :  { %s1624_s17 = smov 0   ;;  %s1626_s18 = smov 0  }
   0xa LB: > { %s1641_s19 = sadd.s32 4294967295, %s1580_s18   ;;  %s1008_s20 = sadd.s32 4294967294, %s1580_s18   ;;  %s1580_s18 = sphi %s1626_s18, %s2052_s18   ;;  %s1576_s17 = sphi %s1624_s17, %s2051_s17   ;;  %s1572_s16 = sphi %s1622_s16, %s2050_s16   ;;  %s1568_s15 = sphi %s1620_s15, %s2049_s15  }
   0xb   : > { %s1645_s21 = sadd.s32 1, %s1580_s18   ;;  %s31_s22 = sadd.s32 1, %s1576_s17 }
   0xc   : > { %s28_s23 = ssub.s32 %s1580_s18, %s1645_s21  ;;  %p38_p0 = scmp.ne.s32.totalorder %s1576_s17, %s1572_s16 }
   0xd   : > { %p29_p1 = scmp.eq.s32.totalorder %s28_s23, 0  ;;  %p39_p2 = scmp.eq.s32.totalorder %s1580_s18, 0 }
   0xe   : > { %p44_p3 = scmp.ne.s32.totalorder %s1572_s16, %s1568_s15  ;;  %p2032_p4 = scmp.eq.s32.totalorder %s1641_s19, 0 }
   0xf   : > { %s1657_s24 = scalar_select %p29_p1, %s1576_s17, %s31_s22  }
  0x10   : > { %p1659_p5 = por %p39_p2, %p38_p0  ;;  %p1665_p6 = por %p2032_p4, %p44_p3 }
  0x11   : > { %p136_p7 = scmp.eq.s32.totalorder %s1641_s19, 1  ;;  %p142_p8 = scmp.eq.s32.totalorder %s1008_s20, 1 }
  0x12   : > { %p1009_p9 = scmp.ge.s32.totalorder %s1580_s18, 1  ;;  %p149_p10 = scmp.lt.s32.totalorder %s1580_s18, 3 }
  0x13   : > { %p1672_p11 = por %p136_p7, %p38_p0  ;;  %p1676_p12 = por %p142_p8, %p44_p3 }
  0x14   : > { %p1680_p13 = pnand %p1009_p9, %p149_p10  ;;  %s2039_s1 = sld [smem:[#allocation15_spill]] }
  0x15   : > { %s2036_s27 = scalar_select %p1672_p11, 1, 0 }
  0x16   : > { %s2037_s28 = scalar_select %p1676_p12, 1, 0 }
  0x17   : > { %p1288_p1 = pneg %p1680_p13  ;;  %s1582_s7 = smov [#allocation5]  }
  0x18   : > { %s162_s8 = sshll.u32 %s1582_s7, 4  ;;  %s175_s11 = sshll.u32 %s2027_s2, 4  ;;  %s163_s8 = int_to_ptr.vmem [resolvable:$true] %s162_s8  ;;  %s176_s11 = int_to_ptr.hbm [resolvable:$true] %s175_s11 }
  0x19   : > { %p1289_p0 = pnand %p1288_p1, %p2032_p4  ;;  %s1583_s12 = smov 64  }
  0x1a   : > { %s160_s6 = sshll.u32 %s2039_s1, 4  ;;  %s1584_s13 = smov 4   ;;  %s161_s6 = int_to_ptr.hbm [resolvable:$true] %s160_s6 }
  0x1b   : > { %1291 = dma.hbm_to_vmem [thread:$0]  (!%p1289_p0), %s161_s6, 4096, %s163_s8, [#allocation6], %s1583_s12, %s1583_s12, %s1584_s13  }
  0x1c   : > { %s1585_s14 = smov [#allocation7]   ;;  %p2030_p2 = scmp.ge.s32.totalorder %s1580_s18, 2 }
  0x1d   : > { %s177_s20 = sshll.u32 %s1585_s14, 4  ;;  %s178_s20 = int_to_ptr.vmem [resolvable:$true] %s177_s20 }
  0x1e   : > { %1294 = dma.hbm_to_vmem [thread:$0]  (!%p1289_p0), %s176_s11, 64, %s178_s20, [#allocation6]  }
  0x1f   : > { %184 = sbr.rel (%p2030_p2) target bundleno = 109 (0x6d), region = 24 }
  0x24   : > { %187 = sbr.rel (!%p1659_p5) target bundleno = 73 (0x49), region = 28  ;;  %s188_s22 = sand.u32 (%p1659_p5), 1, %s1576_s17  }
  0x25   : > { %s1014_s23 = sshll.u32 (%p1659_p5), %s1580_s18, 2  ;;  %s1013_s30 = sshll.u32 (%p1659_p5), %s188_s22, 6 }
  0x26   : > { %s194_s5 = ssub.s32 (%p1659_p5), 6, %s1014_s23  ;;  %s1704_s9 = scalar_lea.sflag (%p1659_p5), [#allocation3], %s188_s22 }
  0x27   : > { %p195_p3 = scmp.lt.s32.totalorder (%p1659_p5), %s194_s5, 4  ;;  %s192_s10 = scalar_lea.vmem (%p1659_p5), [#allocation2], %s1013_s30 }
  0x29   : > { %s2054_s5 = smov (!%p195_p3, %s194_s5), 4 }
  0x2a   : > { %s1212_s6 = sshll.u32 %s2054_s5, 4 }
  0x2b   : > { %s199_s7 = ssub.s32 64, %s1212_s6 }
  0x2c   : > { %s200_s8 = sshll.u32 %s199_s7, 4 }
  0x2d   : > { %201 = vsyncadd %s1704_s9, %s200_s8  ;;  %p1707_p7 = scmp.ne.s32.totalorder %s1212_s6, 0  ;;  %s1214_s12 = sshll.u32 %s1580_s18, 6 }
  0x2e   : > { %s205_s20 = scalar_lea.hbm %s2025_s0, %s1214_s12  ;;  %s1715_s23 = sshll.u32 %s192_s10, 4  ;;  %s210_s23 = int_to_ptr.vmem [resolvable:$true] %s1715_s23 }
  0x2f   : > { %s207_s22 = sshll.u32 %s205_s20, 4  ;;  %s2031_s30 = sshll.u32 %s2054_s5, 8  ;;  %s1718_s22 = int_to_ptr.hbm [resolvable:$true] %s207_s22 }
  0x30   : > { %s1417_s7 = sshra.s32 %s1718_s22, 4  ;;  %s1419_s6 = sshrl.u32 %s2031_s30, 4  ;;  %s1418_s7 = int_to_ptr.hbm [resolvable:$true] %s1417_s7 }
  0x31   : > { %s1424_s8 = scalar_lea.hbm %s1418_s7, %s1419_s6  ;;  %s1428_s10 = scalar_lea.hbm %s2025_s0, 96 }
  0x32   : > { %p1425_p8 = scmp.ne.s32.totalorder %s1418_s7, %s1424_s8  ;;  %p1429_p1 = scmp.lt.s32.totalorder %s1418_s7, %s2025_s0 }
  0x33   : > { %p1430_p0 = scmp.lt.s32.totalorder %s1428_s10, %s1424_s8 }
  0x34   : > { %p1426_p9 = pnand %p1425_p8, %p1707_p7 }
  0x35   : > { %p1431_p3 = por %p1430_p0, %p1429_p1 }
  0x36   : > { %p1427_p10 = pneg %p1426_p9 }
  0x38   : > { %p1432_p2 = pnand %p1431_p3, %p1427_p10 }
  0x3a   : > { %1435 = shalt.err (!%p1432_p2)
}
  0x3b   : > { %s1436_s30 = sshra.s32 %s210_s23, 4  ;;  %s1586_s13 = smov [#allocation2]   ;;  %s1437_s30 = int_to_ptr.vmem [resolvable:$true] %s1436_s30 }
  0x3c   : > { %s1443_s1 = scalar_lea.vmem %s1437_s30, %s1419_s6  ;;  %s1447_s12 = scalar_lea.vmem %s1586_s13, 128 }
  0x3d   : > { %p1444_p8 = scmp.ne.s32.totalorder %s1437_s30, %s1443_s1  ;;  %p1449_p12 = scmp.lt.s32.totalorder %s1447_s12, %s1443_s1 }
  0x3f   : > { %p1445_p9 = pnand %p1444_p8, %p1707_p7 }
  0x41   : > { %p1446_p4 = pneg %p1445_p9 }
  0x43   : > { %p1451_p11 = pnand %p1449_p12, %p1446_p4 }
  0x45   : > { %1454 = shalt.err (!%p1451_p11)
}
  0x46   : > { %s1587_s7 = smov 256   ;;  %s1588_s8 = smov 16  }
  0x47   : > { %s2041_s10 = sshll.u32 %s2054_s5, 8 }
  0x48   : > { %215 = dma.hbm_to_vmem [thread:$0]  (%p1707_p7), %s1718_s22, %s2041_s10, %s210_s23, %s1704_s9, %s1587_s7, %s1587_s7, %s1588_s8  }
  0x49 PF: > { %218 = sbr.rel (!%p1659_p5) target bundleno = 109 (0x6d), region = 32  ;;  %s219_s1 = sand.u32 (%p1659_p5), 1, %s1576_s17  }
  0x4a   : > { %s1023_s30 = sshll.u32 (%p1659_p5), %s1580_s18, 2  ;;  %s1022_s6 = sshll.u32 (%p1659_p5), %s219_s1, 4 }
  0x4b   : > { %s225_s14 = ssub.s32 (%p1659_p5), 6, %s1023_s30  ;;  %s1751_s12 = scalar_lea.sflag (%p1659_p5), [#allocation9], %s219_s1 }
  0x4c   : > { %p226_p4 = scmp.lt.s32.totalorder (%p1659_p5), %s225_s14, 4  ;;  %s223_s5 = scalar_lea.vmem (%p1659_p5), [#allocation8], %s1022_s6 }
  0x4e   : > { %s2056_s14 = smov (!%p226_p4, %s225_s14), 4 }
  0x4f   : > { %s1024_s20 = sshll.u32 %s2056_s14, 2 }
  0x50   : > { %s229_s13 = ssub.s32 16, %s1024_s20 }
  0x51   : > { %s230_s11 = sshll.u32 %s229_s13, 4 }
  0x52   : > { %231 = vsyncadd %s1751_s12, %s230_s11  ;;  %p1754_p5 = scmp.ne.s32.totalorder %s1024_s20, 0  ;;  %s1215_s9 = sshll.u32 %s1580_s18, 4 }
  0x53   : > { %s234_s7 = scalar_lea.hbm %s2028_s3, %s1215_s9  ;;  %s1762_s8 = sshll.u32 %s223_s5, 4  ;;  %s239_s8 = int_to_ptr.vmem [resolvable:$true] %s1762_s8 }
  0x54   : > { %s236_s10 = sshll.u32 %s234_s7, 4  ;;  %s1028_s1 = sshll.u32 %s2056_s14, 6  ;;  %s1765_s10 = int_to_ptr.hbm [resolvable:$true] %s236_s10 }
  0x55   : > { %s1456_s30 = sshra.s32 %s1765_s10, 4  ;;  %s1458_s6 = sshrl.u32 %s1028_s1, 4  ;;  %s1457_s30 = int_to_ptr.hbm [resolvable:$true] %s1456_s30 }
  0x56   : > { %s1463_s20 = scalar_lea.hbm %s1457_s30, %s1458_s6  ;;  %s1467_s5 = scalar_lea.hbm %s2028_s3, 24 }
  0x57   : > { %p1464_p11 = scmp.ne.s32.totalorder %s1457_s30, %s1463_s20  ;;  %p1468_p7 = scmp.lt.s32.totalorder %s1457_s30, %s2028_s3 }
  0x58   : > { %p1469_p10 = scmp.lt.s32.totalorder %s1467_s5, %s1463_s20 }
  0x59   : > { %p1465_p12 = pnand %p1464_p11, %p1754_p5 }
  0x5a   : > { %p1470_p1 = por %p1469_p10, %p1468_p7 }
  0x5b   : > { %p1466_p2 = pneg %p1465_p12 }
  0x5d   : > { %p1471_p0 = pnand %p1470_p1, %p1466_p2 }
  0x5f   : > { %1474 = shalt.err (!%p1471_p0)
}
  0x60   : > { %s1475_s22 = sshra.s32 %s239_s8, 4  ;;  %s1589_s13 = smov [#allocation8]   ;;  %s1476_s22 = int_to_ptr.vmem [resolvable:$true] %s1475_s22 }
  0x61   : > { %s1482_s7 = scalar_lea.vmem %s1476_s22, %s1458_s6  ;;  %s1486_s11 = scalar_lea.vmem %s1589_s13, 32 }
  0x62   : > { %p1483_p3 = scmp.ne.s32.totalorder %s1476_s22, %s1482_s7  ;;  %p1488_p4 = scmp.lt.s32.totalorder %s1486_s11, %s1482_s7 }
  0x64   : > { %p1484_p8 = pnand %p1483_p3, %p1754_p5 }
  0x66   : > { %p1485_p9 = pneg %p1484_p8 }
  0x68   : > { %p1490_p11 = pnand %p1488_p4, %p1485_p9 }
  0x6a   : > { %1493 = shalt.err (!%p1490_p11)
}
  0x6b   : > { %s1590_s30 = smov 64   ;;  %s1591_s20 = smov 4  }
  0x6c   : > { %244 = dma.hbm_to_vmem [thread:$0]  (%p1754_p5), %s1765_s10, %s1028_s1, %s239_s8, %s1751_s12, %s1590_s30, %s1590_s30, %s1591_s20  }
  0x6d PF: > { %250 = sbr.rel (%p1680_p13) target bundleno = 521 (0x209), region = 36  ;;  %s1794_s6 = sand.u32 (!%p1680_p13), 1, %s1572_s16  }
  0x6e   : > { %s1030_s5 = sshll.u32 (!%p1680_p13), %s1794_s6, 6  ;;  %s253_s9 = scalar_lea.sflag (!%p1680_p13), [#allocation3], %s1794_s6 }
  0x6f   : > { %s1798_s23 = scalar_lea.vmem (!%p1680_p13), [#allocation2], %s1030_s5 }
  0x72   : > { %1551 = dma.done.wait (%p1665_p6), %s253_s9, 1024  }
  0x73   : > { %1553 = vsyncadd (%p1665_p6), %s253_s9, 4294966272  ;;  %p2043_p5 = scmp.eq.s32.totalorder %s1641_s19, 0 }
  0x75   : > { %1555 = dma.done.wait (%p2043_p5), [#allocation6], 4160   ;;  %p2044_p13 = pmov %p2043_p5 }
  0x76   : > { %s1033_s29 = sshll.u32 %s1794_s6, 4  ;;  %s273_s14 = scalar_lea.sflag [#allocation9], %s1794_s6 }
  0x77   : > { %1557 = vsyncadd (%p2044_p13), [#allocation6], 4294963136  ;;  %s1812_s12 = scalar_lea.vmem [#allocation8], %s1033_s29 }
  0x78   : > { %1559 = dma.done.wait (%p1665_p6), %s273_s14, 256  }
  0x79   : > { %1561 = vsyncadd (%p1665_p6), %s273_s14, 4294967040  ;;  %v1818_v0 = vld [vmem:[#allocation5 + $0x38] sm:$0xff]  ;;  %v1828_v4 = vld [vmem:[#allocation5 + $0x30] sm:$0xff]  ;;  %s1956_s26 = scalar_lea.vmem [#allocation10], %s1033_s29  ;;  %s870_s25 = scalar_lea.sflag [#allocation4], %s1794_s6 }
  0x7a   : > { %v1820_v1 = vld [vmem:[#allocation5 + $0x78] sm:$0xff]  ;;  %610 = vmatpush.bf16.msra.mxu0 %v1818_v0  ;;  %v1830_v5 = vld [vmem:[#allocation5 + $0x70] sm:$0xff]  ;;  %v1840_v8 = vld [vmem:[#allocation5 + $0x28] sm:$0xff]  ;;  %p2045_p6 = scmp.ne.s32.totalorder %s2036_s27, 0 }
  0x7b   : > { %v1822_v2 = vld [vmem:[#allocation5 + $0xb8] sm:$0xff]  ;;  %624 = vmatpush.bf16.msra.mxu1 %v1820_v1  ;;  %v1834_v6 = vld [vmem:[#allocation5 + $0xb0] sm:$0xff]  ;;  %v1842_v9 = vld [vmem:[#allocation5 + $0x68] sm:$0xff]  ;;  %s1204_s8 = sshll.u32 (%p2045_p6), %s1641_s19, 2 }
  0x7c   : > { %v1824_v3 = vld [vmem:[#allocation5 + $0xf8] sm:$0xff]  ;;  %638 = vmatpush.bf16.msra.mxu2 %v1822_v2  ;;  %v1836_v7 = vld [vmem:[#allocation5 + $0xf0] sm:$0xff]  ;;  %v1846_v10 = vld [vmem:[#allocation5 + $0xa8] sm:$0xff]  ;;  %s878_s10 = ssub.s32 (%p2045_p6), 6, %s1204_s8 }
  0x7d   : > { %652 = vmatpush.bf16.msra.mxu3 %v1824_v3  ;;  %v1848_v11 = vld [vmem:[#allocation5 + $0xe8] sm:$0xff]  ;;  %v1852_v12 = vld [vmem:[#allocation5 + $0x20] sm:$0xff]  ;;  %v1864_v16 = vld [vmem:[#allocation5 + $0x18] sm:$0xff]  ;;  %p879_p12 = scmp.lt.s32.totalorder (%p2045_p6), %s878_s10, 4 }
  0x7e   : > { %611 = vmatpush.bf16.msra.mxu0 %v1828_v4  ;;  %v1854_v13 = vld [vmem:[#allocation5 + $0x60] sm:$0xff]  ;;  %v1866_v17 = vld [vmem:[#allocation5 + $0x58] sm:$0xff]  ;;  %v1218_v20 = vld [vmem:[#allocation5 + $0x10] sm:$0xff] }
  0x7f   : > { %625 = vmatpush.bf16.msra.mxu1 %v1830_v5  ;;  %v1858_v14 = vld [vmem:[#allocation5 + $0xa0] sm:$0xff]  ;;  %v1870_v18 = vld [vmem:[#allocation5 + $0x98] sm:$0xff]  ;;  %v1226_v21 = vld [vmem:[#allocation5 + $0x50] sm:$0xff] }
  0x80   : > { %639 = vmatpush.bf16.msra.mxu2 %v1834_v6  ;;  %v1860_v15 = vld [vmem:[#allocation5 + $0xe0] sm:$0xff]  ;;  %v1872_v19 = vld [vmem:[#allocation5 + $0xd8] sm:$0xff]  ;;  %v1234_v22 = vld [vmem:[#allocation5 + $0x90] sm:$0xff] }
  0x81   : > { %653 = vmatpush.bf16.msra.mxu3 %v1836_v7  ;;  %v1242_v23 = vld [vmem:[#allocation5 + $0xd0] sm:$0xff]  ;;  %v1217_v24 = vld [vmem:[#allocation5 + $0x8] sm:$0xff]  ;;  %v1878_v28 = vld [vmem:[#allocation5] sm:$0xff] }
  0x82   : > { %612 = vmatpush.bf16.msra.mxu0 %v1840_v8  ;;  %v1225_v25 = vld [vmem:[#allocation5 + $0x48] sm:$0xff]  ;;  %v1880_v29 = vld [vmem:[#allocation5 + $0x40] sm:$0xff]  ;;  %v1251_v33 = vld [vmem:[%s1798_s23 + $0x14] sm:$0xf0] }
  0x83   : > { %626 = vmatpush.bf16.msra.mxu1 %v1842_v9  ;;  %v1233_v26 = vld [vmem:[#allocation5 + $0x88] sm:$0xff]  ;;  %v1882_v30 = vld [vmem:[#allocation5 + $0x80] sm:$0xff]  ;;  %v1250_v35 = vld [vmem:[%s1798_s23 + $0xc] sm:$0xf0] }
  0x84   : > { %640 = vmatpush.bf16.msra.mxu2 %v1846_v10  ;;  %v1241_v27 = vld [vmem:[#allocation5 + $0xc8] sm:$0xff]  ;;  %v1884_v31 = vld [vmem:[#allocation5 + $0xc0] sm:$0xff]  ;;  %v1047_v37 = vld [vmem:[%s1798_s23 + $0x18] sm:$0xf0] }
  0x85   : > { %654 = vmatpush.bf16.msra.mxu3 %v1848_v11  ;;  %v1045_v32 = vld [vmem:[%s1798_s23 + $0x8] sm:$0xf]  ;;  %v1037_v34 = vld [vmem:[%s1798_s23] sm:$0xf]  ;;  %v1249_v36 = vld [vmem:[%s1798_s23 + $0xc] sm:$0xf] }
  0x86   : > { %613 = vmatpush.bf16.msra.mxu0 %v1852_v12  ;;  %v1248_v38 = vld [vmem:[%s1798_s23 + $0x4] sm:$0xf]  ;;  %v1039_v39 = vld [vmem:[%s1798_s23 + $0x10] sm:$0xf0]  ;;  %v1046_v40 = vor.u32 %v1251_v33, %v1045_v32  ;;  %v1038_v41 = vor.u32 %v1250_v35, %v1037_v34  ;;  %v1050_v42 = vor.u32 %v1249_v36, %v1047_v37  ;;  %v1185_v44 = vld [vmem:[%s1798_s23 + $0x20] sm:$0xf] }
  0x87   : > { %627 = vmatpush.bf16.msra.mxu1 %v1854_v13  ;;  %v1042_v43 = vor.u32 %v1248_v38, %v1039_v39  ;;  %v1254_v45 = vld [vmem:[%s1798_s23 + $0x2c] sm:$0xf0]  ;;  %v1252_v46 = vld [vmem:[%s1798_s23 + $0x24] sm:$0xf]  ;;  %v1187_v47 = vld [vmem:[%s1798_s23 + $0x30] sm:$0xf0] }
  0x88   : > { %641 = vmatpush.bf16.msra.mxu2 %v1858_v14  ;;  %v1193_v48 = vld [vmem:[%s1798_s23 + $0x28] sm:$0xf]  ;;  %v1255_v49 = vld [vmem:[%s1798_s23 + $0x34] sm:$0xf0]  ;;  %v1253_v50 = vld [vmem:[%s1798_s23 + $0x2c] sm:$0xf]  ;;  %v1186_v52 = vor.u32 %v1254_v45, %v1185_v44  ;;  %v1190_v53 = vor.u32 %v1252_v46, %v1187_v47 }
  0x89   : > { %655 = vmatpush.bf16.msra.mxu3 %v1860_v15  ;;  %v1195_v51 = vld [vmem:[%s1798_s23 + $0x38] sm:$0xf0]  ;;  %v1194_v54 = vor.u32 %v1255_v49, %v1193_v48  ;;  %v1346_v56 = vld [vmem:[#allocation7] ss:$0 sm:$0xff]  ;;  %v1258_v61 = vld [vmem:[%s1812_s12] sm:$0xff]  }
  0x8a   : > { %614 = vmatpush.bf16.msra.mxu0 %v1864_v16  ;;  %v1198_v55 = vor.u32 %v1253_v50, %v1195_v51 }
  0x8b   : > { %628 = vmatpush.bf16.msra.mxu1 %v1866_v17 }
  0x8c   : > { %642 = vmatpush.bf16.msra.mxu2 %v1870_v18 }
  0x8d   : > { %656 = vmatpush.bf16.msra.mxu3 %v1872_v19 }
  0x8e   : > { %615 = vmatpush.bf16.msra.mxu0 %v1218_v20 }
  0x8f   : > { %629 = vmatpush.bf16.msra.mxu1 %v1226_v21 }
  0x90   : > { %643 = vmatpush.bf16.msra.mxu2 %v1234_v22 }
  0x91   : > { %657 = vmatpush.bf16.msra.mxu3 %v1242_v23 }
  0x92   : > { %616 = vmatpush.bf16.msra.mxu0 %v1217_v24 }
  0x93   : > { %630 = vmatpush.bf16.msra.mxu1 %v1225_v25 }
  0x94   : > { %644 = vmatpush.bf16.msra.mxu2 %v1233_v26 }
  0x95   : > { %658 = vmatpush.bf16.msra.mxu3 %v1241_v27 }
  0x96   : > { %617 = vmatpush.bf16.msra.mxu0 %v1878_v28 }
  0x97   : > { %631 = vmatpush.bf16.msra.mxu1 %v1880_v29 }
  0x98   : > { %645 = vmatpush.bf16.msra.mxu2 %v1882_v30 }
  0x99   : > { %659 = vmatpush.bf16.msra.mxu3 %v1884_v31  ;;  %618 = vmatmul.bf16.vlgmr.msra.gmra.mxu0 %v1038_v41 }
  0x9a   : > { %753 = vmatpush.bf16.msrb.mxu0 %v1818_v0  ;;  %632 = vmatmul.bf16.vlgmr.msra.gmra.mxu1 %v1042_v43 }
  0x9b   : > { %767 = vmatpush.bf16.msrb.mxu1 %v1820_v1  ;;  %646 = vmatmul.bf16.vlgmr.msra.gmra.mxu2 %v1046_v40  ;;  %v1259_v1 = vunpack.c.l.bf16 %v1258_v61 }
  0x9c   : > { %781 = vmatpush.bf16.msrb.mxu2 %v1822_v2  ;;  %660 = vmatmul.bf16.vlgmr.msra.gmra.mxu3 %v1050_v42 }
  0x9d   : > { %795 = vmatpush.bf16.msrb.mxu3 %v1824_v3 }
  0x9e   : > { %754 = vmatpush.bf16.msrb.mxu0 %v1828_v4 }
  0x9f   : > { %768 = vmatpush.bf16.msrb.mxu1 %v1830_v5 }
  0xa0   : > { %782 = vmatpush.bf16.msrb.mxu2 %v1834_v6 }
  0xa1   : > { %796 = vmatpush.bf16.msrb.mxu3 %v1836_v7 }
  0xa2   : > { %755 = vmatpush.bf16.msrb.mxu0 %v1840_v8 }
  0xa3   : > { %769 = vmatpush.bf16.msrb.mxu1 %v1842_v9 }
  0xa4   : > { %783 = vmatpush.bf16.msrb.mxu2 %v1846_v10 }
  0xa5   : > { %797 = vmatpush.bf16.msrb.mxu3 %v1848_v11 }
  0xa6   : > { %756 = vmatpush.bf16.msrb.mxu0 %v1852_v12  ;;  %v1260_v12 = vunpack.c.h.bf16 %v1258_v61 }
  0xa7   : > { %770 = vmatpush.bf16.msrb.mxu1 %v1854_v13 }
  0xa8   : > { %784 = vmatpush.bf16.msrb.mxu2 %v1858_v14 }
  0xa9   : > { %798 = vmatpush.bf16.msrb.mxu3 %v1860_v15 }
  0xaa   : > { %757 = vmatpush.bf16.msrb.mxu0 %v1864_v16 }
  0xab   : > { %771 = vmatpush.bf16.msrb.mxu1 %v1866_v17 }
  0xac   : > { %785 = vmatpush.bf16.msrb.mxu2 %v1870_v18 }
  0xad   : > { %799 = vmatpush.bf16.msrb.mxu3 %v1872_v19 }
  0xae   : > { %758 = vmatpush.bf16.msrb.mxu0 %v1218_v20  ;;  %v1275_v20 = vld [vmem:[%s1812_s12 + $0x8] sm:$0xff]  }
  0xaf   : > { %772 = vmatpush.bf16.msrb.mxu1 %v1226_v21  ;;  %v1269_v34 = vunpack.c.h.bf16 %v1275_v20 }
  0xb0   : > { %786 = vmatpush.bf16.msrb.mxu2 %v1234_v22 }
  0xb1   : > { %800 = vmatpush.bf16.msrb.mxu3 %v1242_v23 }
  0xb2   : > { %759 = vmatpush.bf16.msrb.mxu0 %v1217_v24  ;;  %v1268_v24 = vunpack.c.l.bf16 %v1275_v20 }
  0xb3   : > { %773 = vmatpush.bf16.msrb.mxu1 %v1225_v25 }
  0xb4   : > { %787 = vmatpush.bf16.msrb.mxu2 %v1233_v26 }
  0xb5   : > { %801 = vmatpush.bf16.msrb.mxu3 %v1241_v27 }
  0xb6   : > { %760 = vmatpush.bf16.msrb.mxu0 %v1878_v28 }
  0xb7   : > { %774 = vmatpush.bf16.msrb.mxu1 %v1880_v29 }
  0xb8   : > { %788 = vmatpush.bf16.msrb.mxu2 %v1882_v30 }
  0xb9   : > { %802 = vmatpush.bf16.msrb.mxu3 %v1884_v31  ;;  %761 = vmatmul.bf16.vlgmr.msrb.gmra.mxu0 %v1186_v52 }
  0xba   : > { %775 = vmatmul.bf16.vlgmr.msrb.gmra.mxu1 %v1190_v53 }
  0xbb   : > { %789 = vmatmul.bf16.vlgmr.msrb.gmra.mxu2 %v1194_v54 }
  0xbc   : > { %803 = vmatmul.bf16.vlgmr.msrb.gmra.mxu3 %v1198_v55 }
 0x116   : > { %v619_v57 = vpop.f32.mrf.mxu0 }
 0x117   : > { %v620_v58 = vadd.f32 %v1346_v56, %v619_v57  ;;  %v633_v59 = vpop.f32.mrf.mxu1 }
 0x119   : > { %v634_v60 = vadd.f32 %v633_v59, %v620_v58 }
 0x11e   : > { %v647_v62 = vpop.f32.mrf.mxu2  ;;  %v621_v2 = vpop.f32.mrf.mxu0 }
 0x11f   : > { %v648_v63 = vadd.f32 %v647_v62, %v634_v60  ;;  %v661_v0 = vpop.f32.mrf.mxu3  ;;  %v622_v4 = vadd.f32 %v1346_v56, %v621_v2  ;;  %v635_v5 = vpop.f32.mrf.mxu1 }
 0x121   : > { %v662_v3 = vadd.f32 %v661_v0, %v648_v63  ;;  %v636_v7 = vadd.f32 %v635_v5, %v622_v4 }
 0x123   : > { %v1931_v6 = vadd.f32 %v1259_v1, %v662_v3  ;;  %v1347_v3 = vld [vmem:[#allocation7 + $0x1] ss:$0 sm:$0xff] }
 0x125   : > { %672 = vadd.xlane.f32.xlu0 %v1931_v6  ;;  %v678_v8 = vmul.f32 %v1931_v6, %v1931_v6 }
 0x126   : > { %v649_v9 = vpop.f32.mrf.mxu2 }
 0x127   : > { %v650_v10 = vadd.f32 %v649_v9, %v636_v7  ;;  %680 = vadd.xlane.f32.xlu2 %v678_v8  ;;  %v663_v11 = vpop.f32.mrf.mxu3 }
 0x129   : > { %v664_v13 = vadd.f32 %v663_v11, %v650_v10 }
 0x12b   : > { %v1936_v14 = vadd.f32 %v1260_v12, %v664_v13  ;;  %v1348_v13 = vld [vmem:[#allocation7 + $0x2] ss:$0 sm:$0xff] }
 0x12d   : > { %674 = vadd.xlane.f32.xlu0 %v1936_v14  ;;  %v679_v15 = vmul.f32 %v1936_v14, %v1936_v14 }
 0x12f   : > { %682 = vadd.xlane.f32.xlu2 %v679_v15 }
 0x136   : > { %v762_v16 = vpop.f32.mrf.mxu0 }
 0x137   : > { %v763_v17 = vadd.f32 %v1346_v56, %v762_v16  ;;  %v776_v18 = vpop.f32.mrf.mxu1 }
 0x139   : > { %v777_v19 = vadd.f32 %v776_v18, %v763_v17 }
 0x13e   : > { %v790_v21 = vpop.f32.mrf.mxu2  ;;  %v764_v25 = vpop.f32.mrf.mxu0 }
 0x13f   : > { %v804_v22 = vpop.f32.mrf.mxu3  ;;  %v791_v23 = vadd.f32 %v790_v21, %v777_v19  ;;  %v765_v27 = vadd.f32 %v1346_v56, %v764_v25  ;;  %v778_v29 = vpop.f32.mrf.mxu1 }
 0x141   : > { %v805_v26 = vadd.f32 %v804_v22, %v791_v23  ;;  %v779_v30 = vadd.f32 %v778_v29, %v765_v27 }
 0x143   : > { %v1942_v28 = vadd.f32 %v1268_v24, %v805_v26 }
 0x145   : > { %816 = vadd.xlane.f32.xlu1 %v1942_v28  ;;  %v822_v31 = vmul.f32 %v1942_v28, %v1942_v28 }
 0x146   : > { %v792_v32 = vpop.f32.mrf.mxu2 }
 0x147   : > { %v793_v33 = vadd.f32 %v792_v32, %v779_v30  ;;  %824 = vadd.xlane.f32.xlu0 %v822_v31  ;;  %v806_v35 = vpop.f32.mrf.mxu3 }
 0x149   : > { %v807_v36 = vadd.f32 %v806_v35, %v793_v33 }
 0x14b   : > { %v1947_v37 = vadd.f32 %v1269_v34, %v807_v36 }
 0x14d   : > { %818 = vadd.xlane.f32.xlu1 %v1947_v37  ;;  %v823_v38 = vmul.f32 %v1947_v37, %v1947_v37 }
 0x155   : > { %826 = vadd.xlane.f32.xlu1 %v823_v38 }
 0x198   : > { %v673_v39 = vpop.xlane.xlu0 %672 }
 0x199   : > { %v676_v40 = vmul.f32 0.0078125, %v673_v39 }
 0x19a   : > { %v681_v41 = vpop.xlane.xlu2 %680 }
 0x19b   : > { %v686_v42 = vmul.f32 %v676_v40, %v676_v40  ;;  %v684_v43 = vmul.f32 0.0078125, %v681_v41  ;;  %v690_v0 = vsub.f32 %v1931_v6, %v676_v40 }
 0x19d   : > { %v688_v44 = vsub.f32 %v684_v43, %v686_v42 }
 0x19f   : > { %v692_v45 = vadd.f32 1e-12, %v688_v44 }
 0x1a0   : > { %v675_v46 = vpop.xlane.xlu0 %674 }
 0x1a1   : > { %1349 = vrsqrt.f32 %v692_v45  ;;  %v677_v47 = vmul.f32 0.0078125, %v675_v46  ;;  %vm700_vm0 = vweird.f32 %v692_v45 }
 0x1a2   : > { %v683_v48 = vpop.xlane.xlu2 %682 }
 0x1a3   : > { %v687_v49 = vmul.f32 %v677_v47, %v677_v47  ;;  %v685_v50 = vmul.f32 0.0078125, %v683_v48  ;;  %v691_v9 = vsub.f32 %v1936_v14, %v677_v47 }
 0x1a5   : > { %v689_v51 = vsub.f32 %v685_v50, %v687_v49 }
 0x1a7   : > { %v1350_v52 = vpop.eup %1349  ;;  %v693_v53 = vadd.f32 1e-12, %v689_v51 }
 0x1a8   : > { %v695_v54 = vmul.f32 %v1350_v52, %v692_v45  ;;  %vm701_vm1 = vweird.f32 %v1350_v52 }
 0x1a9   : > { %1351 = vrsqrt.f32 %v693_v53  ;;  %vm702_vm2 = vmor %vm700_vm0, %vm701_vm1  ;;  %vm710_vm4 = vweird.f32 %v693_v53 }
 0x1aa   : > { %v696_v55 = vmul.f32 %v1350_v52, %v695_v54 }
 0x1ac   : > { %v697_v56 = vmul.f32 0.5, %v696_v55 }
 0x1ae   : > { %v698_v57 = vsub.f32 1.5, %v697_v56 }
 0x1af   : > { %v1352_v58 = vpop.eup %1351 }
 0x1b0   : > { %v699_v59 = vmul.f32 %v1350_v52, %v698_v57  ;;  %v705_v60 = vmul.f32 %v1352_v58, %v693_v53  ;;  %vm711_vm3 = vweird.f32 %v1352_v58 }
 0x1b1   : > { %vm712_vm5 = vmor %vm710_vm4, %vm711_vm3 }
 0x1b2   : > { %v706_v61 = vmul.f32 %v1352_v58, %v705_v60  ;;  %v703_v62 = vsel %vm702_vm2, %v1350_v52, %v699_v59 }
 0x1b3   : > { %v714_v4 = vmul.f32 %v703_v62, %v690_v0 }
 0x1b4   : > { %v707_v63 = vmul.f32 0.5, %v706_v61 }
 0x1b5   : > { %v717_v15 = vmul.f32 %v1347_v3, %v714_v4 }
 0x1b6   : > { %v708_v1 = vsub.f32 1.5, %v707_v63 }
 0x1b7   : > { %v720_v20 = vadd.f32 %v1348_v13, %v717_v15 }
 0x1b8   : > { %v817_v2 = vpop.xlane.xlu1 %816  ;;  %v709_v7 = vmul.f32 %v1352_v58, %v708_v1 }
 0x1b9   : > { %v820_v5 = vmul.f32 0.0078125, %v817_v2 }
 0x1ba   : > { %v825_v8 = vpop.xlane.xlu0 %824  ;;  %v713_v12 = vsel %vm712_vm5, %v1352_v58, %v709_v7 }
 0x1bb   : > { %v830_v10 = vmul.f32 %v820_v5, %v820_v5  ;;  %v828_v11 = vmul.f32 0.0078125, %v825_v8  ;;  %v715_v16 = vmul.f32 %v713_v12, %v691_v9  ;;  %v834_v41 = vsub.f32 %v1942_v28, %v820_v5 }
 0x1bd   : > { %v832_v6 = vsub.f32 %v828_v11, %v830_v10  ;;  %v718_v17 = vmul.f32 %v1347_v3, %v715_v16 }
 0x1bf   : > { %v836_v18 = vadd.f32 1e-12, %v832_v6  ;;  %v721_v21 = vadd.f32 %v1348_v13, %v718_v17 }
 0x1c0   : > { %v819_v19 = vpop.xlane.xlu1 %818 }
 0x1c1   : > { %1353 = vrsqrt.f32 %v836_v18  ;;  %v1264_v22 = vpack.c.bf16 %v721_v21, %v720_v20  ;;  %v821_v14 = vmul.f32 0.0078125, %v819_v19  ;;  %vm844_vm7 = vweird.f32 %v836_v18 }
 0x1c3   : > { %1265 = vst [vmem:[%s1956_s26] sm:$0xff] %v1264_v22   ;;  %v831_v26 = vmul.f32 %v821_v14, %v821_v14  ;;  %v835_v45 = vsub.f32 %v1947_v37, %v821_v14 }
 0x1c7   : > { %v1354_v23 = vpop.eup %1353 }
 0x1c8   : > { %v839_v24 = vmul.f32 %v1354_v23, %v836_v18  ;;  %v827_v25 = vpop.xlane.xlu1 %826  ;;  %vm845_vm6 = vweird.f32 %v1354_v23 }
 0x1c9   : > { %v829_v27 = vmul.f32 0.0078125, %v827_v25  ;;  %vm846_vm8 = vmor %vm844_vm7, %vm845_vm6 }
 0x1ca   : > { %v840_v29 = vmul.f32 %v1354_v23, %v839_v24 }
 0x1cb   : > { %v833_v30 = vsub.f32 %v829_v27, %v831_v26 }
 0x1cc   : > { %v841_v32 = vmul.f32 0.5, %v840_v29 }
 0x1cd   : > { %v837_v31 = vadd.f32 1e-12, %v833_v30 }
 0x1ce   : > { %v842_v33 = vsub.f32 1.5, %v841_v32 }
 0x1cf   : > { %1355 = vrsqrt.f32 %v837_v31  ;;  %vm854_vm10 = vweird.f32 %v837_v31 }
 0x1d0   : > { %v843_v35 = vmul.f32 %v1354_v23, %v842_v33 }
 0x1d2   : > { %v847_v39 = vsel %vm846_vm8, %v1354_v23, %v843_v35 }
 0x1d3   : > { %v858_v43 = vmul.f32 %v847_v39, %v834_v41 }
 0x1d5   : > { %v1356_v34 = vpop.eup %1355  ;;  %v860_v47 = vmul.f32 %v1347_v3, %v858_v43 }
 0x1d6   : > { %v849_v36 = vmul.f32 %v1356_v34, %v837_v31  ;;  %vm855_vm9 = vweird.f32 %v1356_v34 }
 0x1d7   : > { %vm856_vm11 = vmor %vm854_vm10, %vm855_vm9  ;;  %v862_v50 = vadd.f32 %v1348_v13, %v860_v47 }
 0x1d8   : > { %v850_v38 = vmul.f32 %v1356_v34, %v849_v36 }
 0x1da   : > { %v851_v40 = vmul.f32 0.5, %v850_v38 }
 0x1dc   : > { %v852_v42 = vsub.f32 1.5, %v851_v40 }
 0x1de   : > { %v853_v44 = vmul.f32 %v1356_v34, %v852_v42 }
 0x1e0   : > { %v857_v46 = vsel %vm856_vm11, %v1356_v34, %v853_v44 }
 0x1e1   : > { %v859_v48 = vmul.f32 %v857_v46, %v835_v45 }
 0x1e3   : > { %v861_v49 = vmul.f32 %v1347_v3, %v859_v48 }
 0x1e5   : > { %v863_v51 = vadd.f32 %v1348_v13, %v861_v49  ;;  %876 = sbr.rel (!%p2045_p6) target bundleno = 521 (0x209), region = 56 }
 0x1e7   : > { %v1273_v52 = vpack.c.bf16 %v863_v51, %v862_v50 }
 0x1e9   : > { %1276 = vst [vmem:[%s1956_s26 + $0x8] sm:$0xff] %v1273_v52  }
 0x1ea   : > { %s2058_s10 = smov (!%p879_p12, %s878_s10), 4 }
 0x1eb   : > { %s1205_s1 = sshll.u32 %s2058_s10, 2 }
 0x1ec   : > { %s882_s22 = ssub.s32 16, %s1205_s1 }
 0x1ed   : > { %s883_s7 = sshll.u32 %s882_s22, 4 }
 0x1ee   : > { %884 = vsyncadd %s870_s25, %s883_s7  ;;  %p1971_p2 = scmp.ne.s32.totalorder %s1205_s1, 0  ;;  %s1256_s13 = sshll.u32 %s1641_s19, 4 }
 0x1ef   : > { %s887_s20 = scalar_lea.hbm %s2029_s4, %s1256_s13  ;;  %s889_s5 = sshll.u32 %s1956_s26, 4  ;;  %s1980_s5 = int_to_ptr.vmem [resolvable:$true] %s889_s5 }
 0x1f0   : > { %s891_s9 = sshll.u32 %s887_s20, 4  ;;  %s1209_s23 = sshll.u32 %s2058_s10, 6  ;;  %s1982_s9 = int_to_ptr.hbm [resolvable:$true] %s891_s9 }
 0x1f1   : > { %s1495_s29 = sshra.s32 %s1980_s5, 4  ;;  %s1497_s14 = sshrl.u32 %s1209_s23, 4  ;;  %s1496_s29 = int_to_ptr.vmem [resolvable:$true] %s1495_s29 }
 0x1f2   : > { %s1502_s12 = scalar_lea.vmem %s1496_s29, %s1497_s14  ;;  %s1592_s19 = smov [#allocation10]  }
 0x1f3   : > { %p1503_p7 = scmp.ne.s32.totalorder %s1496_s29, %s1502_s12  ;;  %s1506_s8 = scalar_lea.vmem %s1592_s19, 32 }
 0x1f4   : > { %p1508_p0 = scmp.lt.s32.totalorder %s1506_s8, %s1502_s12 }
 0x1f5   : > { %p1504_p10 = pnand %p1503_p7, %p1971_p2 }
 0x1f7   : > { %p1505_p1 = pneg %p1504_p10 }
 0x1f9   : > { %p1510_p3 = pnand %p1508_p0, %p1505_p1 }
 0x1fb   : > { %1513 = shalt.err (!%p1510_p3)
}
 0x1fc   : > { %s1514_s26 = sshra.s32 %s1982_s9, 4  ;;  %s1525_s13 = scalar_lea.hbm %s2029_s4, 24  ;;  %s1515_s26 = int_to_ptr.hbm [resolvable:$true] %s1514_s26 }
 0x1fd   : > { %s1521_s1 = scalar_lea.hbm %s1515_s26, %s1497_s14  ;;  %p1526_p11 = scmp.lt.s32.totalorder %s1515_s26, %s2029_s4 }
 0x1fe   : > { %p1522_p8 = scmp.ne.s32.totalorder %s1515_s26, %s1521_s1  ;;  %p1527_p5 = scmp.lt.s32.totalorder %s1525_s13, %s1521_s1 }
 0x200   : > { %p1523_p9 = pnand %p1522_p8, %p1971_p2  ;;  %p1528_p13 = por %p1527_p5, %p1526_p11 }
 0x202   : > { %p1524_p4 = pneg %p1523_p9 }
 0x204   : > { %p1529_p6 = pnand %p1528_p13, %p1524_p4 }
 0x206   : > { %1532 = shalt.err (!%p1529_p6)
}
 0x207   : > { %s1593_s20 = smov 64   ;;  %s1594_s29 = smov 4  }
 0x208   : > { %897 = dma.vmem_to_hbm [thread:$0]  (%p1971_p2), %s1980_s5, %s1209_s23, %s1982_s9, %s870_s25, %s1593_s20, %s1593_s20, %s1594_s29  }
 0x209 PF: > { %s906_s14 = sand.u32 1, %s1568_s15   ;;  %p2047_p12 = scmp.ne.s32.totalorder %s2037_s28, 0 }
 0x20a   : > { %p2048_p7 = scmp.ge.s32.totalorder %s1580_s18, 2  ;;  %s907_s12 = scalar_lea.sflag [#allocation4], %s906_s14 }
 0x20c   : > { %p1296_p10 = pnand %p2048_p7, %p2047_p12 }
 0x20e   : > { %p1297_p1 = pneg %p1296_p10 }
 0x210   : > { %1563 = dma.done.wait (%p1297_p1), %s907_s12, 256  }
 0x211   : > { %1565 = vsyncadd (%p1297_p1), %s907_s12, 4294967040  ;;  %p21_p0 = scmp.ge.s32.totalorder %s1645_s21, 4   ;;  %s2049_s15 = smov %s1572_s16 }
 0x212   : > { %s2050_s16 = smov %s1576_s17  ;;  %s2051_s17 = smov %s1657_s24 }
 0x213   : > { %s2052_s18 = smov %s1645_s21  ;;  %23 = sbr.rel (!%p21_p0) target bundleno = 10 (0xa), region = 106 }
 0x218   :  { %913 = vsyncpa [#allocation3], 1 }
 0x219   :  { %915 = vsyncpa [#allocation3 + $0x1], 1 }
 0x21a   :  { %916 = vsyncpa [#allocation6], 1 }
 0x21b   :  { %917 = vsyncpa [#allocation9], 1 }
 0x21c   :  { %919 = vsyncpa [#allocation9 + $0x1], 1 }
 0x21d   :  { %920 = vsyncpa [#allocation4], 1 }
 0x21e   :  { %922 = vsyncpa [#allocation4 + $0x1], 1 }

</bundles_post_ra>
